<compile_context>
chip_gen: v7x
topology: tpu7x:2x2x1
jax: 0.10.0
libtpu: 0.0.40
codegen_flags: <defaults>
</compile_context>

<pallas_src>
import math
import functools

import jax
import jax.numpy as jnp
from jax.experimental import pallas as pl
from jax.experimental.pallas import tpu as pltpu


# ---------------------------------------------------------------------------
# Kernels. All operate on lane-dense 2-D blocks: x/out/bits are [tS, B*D],
# pe is [tS, D] and broadcast over batch in-kernel.
# ---------------------------------------------------------------------------

def _pe_add_kernel(x_ref, pe_ref, o_ref, *, batch):
    # eval-mode forward: out = x + pe (dropout is identity when not training)
    pe_b = jnp.tile(pe_ref[...].astype(jnp.float32), (1, batch))      # [tS, B*D]
    y = x_ref[...].astype(jnp.float32) + pe_b
    o_ref[...] = y.astype(o_ref.dtype)


def _pe_add_dropout_rng_kernel(x_ref, pe_ref, seed_ref, o_ref, *, batch, threshold, scale):
    # Default training path: dropout bits generated in-kernel (no HBM bits stream).
    pltpu.prng_seed(seed_ref[0] + pl.program_id(0))                    # per-tile seed
    bits = pltpu.bitcast(pltpu.prng_random_bits(o_ref.shape), jnp.uint32)
    pe_b = jnp.tile(pe_ref[...].astype(jnp.float32), (1, batch))
    y = x_ref[...].astype(jnp.float32) + pe_b
    keep = bits >= jnp.uint32(threshold)                               # P(keep) = 1 - p
    o_ref[...] = (jnp.where(keep, y, jnp.float32(0.0)) * jnp.float32(scale)).astype(o_ref.dtype)


def _pe_add_dropout_bits_kernel(x_ref, pe_ref, bits_ref, o_ref, *, batch, threshold, scale):
    # Host-RNG fallback (interpret/debug): uint16 bits streamed through the pipeline.
    pe_b = jnp.tile(pe_ref[...].astype(jnp.float32), (1, batch))
    y = x_ref[...].astype(jnp.float32) + pe_b
    keep = bits_ref[...].astype(jnp.int32) >= jnp.int32(threshold)     # P(keep) = 1 - p
    o_ref[...] = (jnp.where(keep, y, jnp.float32(0.0)) * jnp.float32(scale)).astype(o_ref.dtype)


# ---------------------------------------------------------------------------
# Tiling helpers
# ---------------------------------------------------------------------------

def _vmem_limit_bytes() -> int:
    """Per-generation VMEM cap: 96 MiB on 128-MiB parts (v5e/v6e), 48 MiB otherwise (v7x / unknown)."""
    try:
        cap = int(pltpu.get_tpu_info().vmem_capacity_bytes)
    except Exception:
        cap = 0
    if cap >= 128 * 1024 * 1024:
        return 96 * 1024 * 1024
    return 48 * 1024 * 1024


def _tile_rows(S: int, row_bytes: int, vmem_limit: int) -> int:
    """Largest seq-tile whose total double-buffered per-step footprint fits the VMEM budget."""
    budget = (vmem_limit * 17) // 20                      # ~85% of limit; headroom for scratch
    rows = max(1, budget // (2 * max(1, row_bytes)))      # x2: double-buffered pipeline
    if rows >= S:
        return S
    rows = max(8, (rows // 8) * 8)                        # tS is the sublane axis of the 2-D block
    return min(rows, S)


# ---------------------------------------------------------------------------
# Module-equivalent wrapper
# ---------------------------------------------------------------------------

class PositionalEncoding:
    """JAX/Pallas port of the PyTorch PositionalEncoding module (forward only)."""

    def __init__(self, d_model: int, dropout: float = 0.1, max_len: int = 5000):
        self.p = float(dropout)
        self.d_model = int(d_model)
        # buffer 'pe' built exactly as in the PyTorch __init__
        position = jnp.arange(max_len, dtype=jnp.float32)[:, None]           # [max_len, 1]
        div_term = jnp.exp(
            jnp.arange(0, d_model, 2, dtype=jnp.float32) * (-math.log(10000.0) / d_model)
        )                                                                     # [d_model/2]
        pe = jnp.zeros((max_len, 1, d_model), dtype=jnp.float32)
        pe = pe.at[:, 0, 0::2].set(jnp.sin(position * div_term))
        pe = pe.at[:, 0, 1::2].set(jnp.cos(position * div_term))
        self.pe = pe                                                          # [max_len, 1, d_model]

    def __call__(self, x, *, training: bool = False, rng=None, use_host_rng: bool = False):
        """x: [seq_len, batch, d_model] -> [seq_len, batch, d_model]."""
        S, B, D = x.shape
        assert D == self.d_model
        apply_dropout = training and self.p > 0.0

        if apply_dropout and self.p >= 1.0:
            return jnp.zeros_like(x)                     # matches torch.nn.Dropout(p=1.0)

        BD = B * D
        x2d = x.reshape(S, BD)                           # free reshape (contiguous dims)
        pe2d = self.pe[:S, 0, :]                         # [S, D], kept in f32 (pe traffic is 1/B of x)
        x_bytes = jnp.dtype(x.dtype).itemsize

        vmem_limit = _vmem_limit_bytes()
        compiler_params = pltpu.CompilerParams(
            dimension_semantics=("parallel",),
            vmem_limit_bytes=vmem_limit,
        )
        # TODO(synk): on v7x, confirm with xprof that the single "parallel" seq axis
        # actually shards across both TensorCores; otherwise switch to
        # pltpu.CORE_PARALLEL / pl.core_map.

        out_shape = jax.ShapeDtypeStruct((S, BD), x.dtype)

        def full_spec(tS):
            return pl.BlockSpec((tS, BD), lambda i: (i, 0))

        def pe_spec(tS):
            return pl.BlockSpec((tS, D), lambda i: (i, 0))

        if not apply_dropout:
            row_bytes = BD * 2 * x_bytes + D * 4
            tS = _tile_rows(S, row_bytes, vmem_limit)
            out2d = pl.pallas_call(
                functools.partial(_pe_add_kernel, batch=B),
                out_shape=out_shape,
                grid=(pl.cdiv(S, tS),),
                in_specs=[full_spec(tS), pe_spec(tS)],
                out_specs=full_spec(tS),
                compiler_params=compiler_params,
            )(x2d, pe2d)
            return out2d.reshape(S, B, D)

        if rng is None:
            raise ValueError("training=True with dropout > 0 requires an explicit `rng` key")
        scale = 1.0 / (1.0 - self.p)

        if use_host_rng:
            # Interpret/debug fallback: uint16 bits from the host (half the traffic of uint32).
            bits = jax.random.bits(rng, (S, BD), dtype=jnp.uint16)
            threshold = min(int(round(self.p * 2 ** 16)), 2 ** 16 - 1)
            row_bytes = BD * (2 * x_bytes + 2) + D * 4
            tS = _tile_rows(S, row_bytes, vmem_limit)
            kernel = functools.partial(_pe_add_dropout_bits_kernel,
                                       batch=B, threshold=threshold, scale=scale)
            out2d = pl.pallas_call(
                kernel,
                out_shape=out_shape,
                grid=(pl.cdiv(S, tS),),
                in_specs=[full_spec(tS), pe_spec(tS), full_spec(tS)],
                out_specs=full_spec(tS),
                compiler_params=compiler_params,
            )(x2d, pe2d, bits)
            return out2d.reshape(S, B, D)

        # Default path: in-kernel PRNG, no bits HBM stream. Seed derived from the key.
        seed = jax.random.randint(rng, (1,), 0, jnp.iinfo(jnp.int32).max, dtype=jnp.int32)
        threshold = min(int(round(self.p * 2 ** 32)), 2 ** 32 - 1)
        row_bytes = BD * 2 * x_bytes + D * 4
        tS = _tile_rows(S, row_bytes, vmem_limit)
        kernel = functools.partial(_pe_add_dropout_rng_kernel,
                                   batch=B, threshold=threshold, scale=scale)
        out2d = pl.pallas_call(
            kernel,
            out_shape=out_shape,
            grid=(pl.cdiv(S, tS),),
            in_specs=[full_spec(tS), pe_spec(tS),
                      pl.BlockSpec(memory_space=pltpu.MemorySpace.SMEM)],
            out_specs=full_spec(tS),
            compiler_params=compiler_params,
        )(x2d, pe2d, seed)
        return out2d.reshape(S, B, D)


# ---------------------------------------------------------------------------
# Demo / correctness check
# ---------------------------------------------------------------------------

if __name__ == "__main__":
    seq_len, batch, d_model = 8, 2, 32

    key = jax.random.PRNGKey(0)
    x = jax.random.normal(key, (seq_len, batch, d_model), dtype=jnp.float32)

    module = PositionalEncoding(d_model=d_model, dropout=0.1, max_len=5000)

    # --- eval-mode path (dropout = identity): must match the reference ---
    y_eval = jax.block_until_ready(module(x, training=False))
    ref = x + module.pe[:seq_len]
    assert y_eval.shape == (seq_len, batch, d_model)
    assert jnp.allclose(y_eval, ref, atol=1e-6), "eval-mode mismatch vs reference"

    # --- training-mode path, host-RNG fallback (portable to the interpret sandbox) ---
    # TODO(synk): on real hardware prefer the default path (use_host_rng=False), which
    # generates dropout bits in-kernel with pltpu.prng_random_bits and avoids the HBM
    # bits stream entirely.
    drop_key = jax.random.PRNGKey(1234)
    y_train = jax.block_until_ready(module(x, training=True, rng=drop_key, use_host_rng=True))
    assert y_train.shape == (seq_len, batch, d_model)
    assert bool(jnp.all(jnp.isfinite(y_train)))

    # reconstruct the exact expected dropout result host-side
    bits = jax.random.bits(drop_key, (seq_len, batch * d_model), dtype=jnp.uint16)
    bits = bits.reshape(seq_len, batch, d_model)
    threshold = min(int(round(module.p * 2 ** 16)), 2 ** 16 - 1)
    keep = bits.astype(jnp.int32) >= threshold
    scale = jnp.float32(1.0 / (1.0 - module.p))
    expected = jnp.where(keep, ref.astype(jnp.float32) * scale, 0.0)
    assert jnp.allclose(y_train, expected, atol=1e-5), "training-mode mismatch vs reference"

    print("KERNEL_OK")
</pallas_src>

<mosaic_0001>
module attributes {stable_mosaic.version = 11 : i64} {
  func.func @_pe_add_kernel(%arg0: i32, %arg1: memref<8x64xf32, #tpu.memory_space<vmem>>, %arg2: memref<8x32xf32, #tpu.memory_space<vmem>>, %arg3: memref<8x64xf32, #tpu.memory_space<vmem>>) attributes {dimension_semantics = [#tpu.dimension_semantics<parallel>], iteration_bounds = array<i64: 1>, scalar_prefetch = 0 : i64, scratch_operands = 0 : i64, tpu.core_type = #tpu.core_type<tc>, window_params = [{transform_indices = @transform_0, window_bounds = array<i64: 8, 64>}, {transform_indices = @transform_1, window_bounds = array<i64: 8, 32>}, {transform_indices = @transform_2, window_bounds = array<i64: 8, 64>}]} {
    %c0 = arith.constant 0 : index
    %c0_0 = arith.constant 0 : index
    %0 = vector.load %arg2[%c0, %c0_0] : memref<8x32xf32, #tpu.memory_space<vmem>>, vector<8x32xf32>
    %1 = tpu.concatenate %0, %0 in 1 : vector<8x32xf32>, vector<8x32xf32> -> vector<8x64xf32>
    %c0_1 = arith.constant 0 : index
    %c0_2 = arith.constant 0 : index
    %2 = vector.load %arg1[%c0_1, %c0_2] : memref<8x64xf32, #tpu.memory_space<vmem>>, vector<8x64xf32>
    %3 = arith.addf %2, %1 : vector<8x64xf32>
    %c0_3 = arith.constant 0 : index
    %c0_4 = arith.constant 0 : index
    %4 = vector.load %arg3[%c0_3, %c0_4] : memref<8x64xf32, #tpu.memory_space<vmem>>, vector<8x64xf32>
    tpu.vector_store %arg3[%c0_3, %c0_4], %3 {strides = array<i32>} : memref<8x64xf32, #tpu.memory_space<vmem>>, vector<8x64xf32>,
    return
  }
  func.func @transform_0(%arg0: i32) -> (i32, i32) {
    %c0_i32 = arith.constant 0 : i32
    %c0_i32_0 = arith.constant 0 : i32
    return %arg0, %c0_i32 : i32, i32
  }
  func.func @transform_1(%arg0: i32) -> (i32, i32) {
    %c0_i32 = arith.constant 0 : i32
    %c0_i32_0 = arith.constant 0 : i32
    return %arg0, %c0_i32 : i32, i32
  }
  func.func @transform_2(%arg0: i32) -> (i32, i32) {
    %c0_i32 = arith.constant 0 : i32
    %c0_i32_0 = arith.constant 0 : i32
    return %arg0, %c0_i32 : i32, i32
  }
}

</mosaic_0001>

<bundles_post_ra>
// kernel: tpu_custom_call.1
= control target key start
LH: loop header
LB: loop body
LE: loop exit
PB: predicated region body
PF: predicated region fallthrough
CT: control target
= control target key end

     0   :  { %7 = vsyncpa [#allocation3], 0  ;;  %s194_s0 = inlined_call_operand.hbm [shape: f32[8,64], index: 0, kind: input, shape index: {}]   ;;  %s195_s1 = inlined_call_operand.hbm [shape: f32[8,32], index: 1, kind: input, shape index: {}]   ;;  %s196_s2 = inlined_call_operand.hbm [shape: f32[8,64], index: 2, kind: output, shape index: {}]  }
   0x1   :  { %8 = vsyncpa [#allocation6], 0 }
   0x2   :  { %9 = vsyncpa [#allocation4], 0  ;;  %s139_s9 = smov [#allocation2]   ;;  %s140_s11 = smov [#allocation5]  }
   0x3   :  { %s16_s10 = sshll.u32 %s139_s9, 4  ;;  %s26_s12 = sshll.u32 %s140_s11, 4  ;;  %s17_s10 = int_to_ptr.vmem [resolvable:$true] %s16_s10  ;;  %s27_s12 = int_to_ptr.vmem [resolvable:$true] %s26_s12 }
   0x4   :  { %s67_s15 = scalar_lea.hbm %s194_s0, 128 }
   0x5   :  { %p68_p0 = scmp.ne.s32.totalorder %s194_s0, %s67_s15  ;;  %p71_p1 = scmp.lt.u32.totalorder %s67_s15, %s194_s0 }
   0x7   :  { %p73_p2 = pnand %p71_p1, %p68_p0 }
   0x9   :  { %76 = shalt.err (!%p73_p2)
}
   0xa   :  { %s77_s20 = scalar_lea.vmem %s17_s10, 128  ;;  %p82_p4 = scmp.lt.s32.totalorder %s17_s10, %s17_s10 }
   0xb   :  { %p78_p3 = scmp.ne.s32.totalorder %s17_s10, %s77_s20  ;;  %p83_p5 = scmp.lt.s32.totalorder %s77_s20, %s77_s20 }
   0xd   :  { %p84_p6 = por %p83_p5, %p82_p4 }
   0xf   :  { %p85_p7 = pnand %p84_p6, %p78_p3 }
  0x11   :  { %88 = shalt.err (!%p85_p7)
}
  0x12   :  { %19 = dma.hbm_to_vmem [thread:$0]  %s194_s0, 128, %s17_s10, [#allocation3]  }
  0x13   :  { %s89_s25 = scalar_lea.hbm %s195_s1, 128 }
  0x14   :  { %p90_p8 = scmp.ne.s32.totalorder %s195_s1, %s89_s25  ;;  %p93_p9 = scmp.lt.u32.totalorder %s89_s25, %s195_s1 }
  0x16   :  { %p95_p10 = pnand %p93_p9, %p90_p8 }
  0x18   :  { %98 = shalt.err (!%p95_p10)
}
  0x19   :  { %s99_s30 = scalar_lea.vmem %s27_s12, 128  ;;  %p104_p12 = scmp.lt.s32.totalorder %s27_s12, %s27_s12 }
  0x1a   :  { %p100_p11 = scmp.ne.s32.totalorder %s27_s12, %s99_s30  ;;  %p105_p13 = scmp.lt.s32.totalorder %s99_s30, %s99_s30 }
  0x1c   :  { %p106_p0 = por %p105_p13, %p104_p12 }
  0x1e   :  { %p107_p1 = pnand %p106_p0, %p100_p11 }
  0x20   :  { %110 = shalt.err (!%p107_p1)
}
  0x21   :  { %29 = dma.hbm_to_vmem [thread:$0]  %s195_s1, 128, %s27_s12, [#allocation6]  }
  0x22   :  { %133 = dma.done.wait [#allocation3], 128  }
  0x23   :  { %134 = vsyncadd [#allocation3], 4294967168 }
  0x24   :  { %135 = dma.done.wait [#allocation6], 128  }
  0x25   :  { %136 = vsyncadd [#allocation6], 4294967168  ;;  %v36_v0 = vld [vmem:[#allocation5] sm:$0xff]  ;;  %s141_s4 = smov 32   ;;  %vm41_vm0 = vcmask 261120   ;;  %v43_v1 = vld [vmem:[#allocation2] sm:$0xff] }
  0x26   :  { %38 = vrot.lane.b32.xlu0 %v36_v0, %s141_s4  ;;  %s142_s5 = smov [#allocation7]   ;;  %vm45_vm1 = vcmask 523264  }
  0x27   :  { %s53_s6 = sshll.u32 %s142_s5, 4  ;;  %s54_s6 = int_to_ptr.vmem [resolvable:$true] %s53_s6 }
  0x28   :  { %s111_s7 = scalar_lea.vmem %s54_s6, 128  ;;  %p116_p3 = scmp.lt.s32.totalorder %s54_s6, %s54_s6 }
  0x29   :  { %p112_p2 = scmp.ne.s32.totalorder %s54_s6, %s111_s7  ;;  %p117_p4 = scmp.lt.s32.totalorder %s111_s7, %s111_s7 }
  0x2b   :  { %p118_p5 = por %p117_p4, %p116_p3 }
  0x2d   :  { %p119_p6 = pnand %p118_p5, %p112_p2 }
  0x98   :  { %v39_v2 = vpop.permute.xlu0 %38 }
  0x99   :  { %v42_v3 = vsel %vm41_vm0, %v36_v0, %v39_v2 }
  0x9a   :  { %v44_v4 = vadd.f32 %v43_v1, %v42_v3 }
  0x9c   :  { %46 = vst.msk [vmem:[#allocation7] sm:$0xff] %vm45_vm1, %v44_v4 }
  0x9d   :  { %122 = shalt.err (!%p119_p6)
}
  0x9e   :  { %s123_s9 = scalar_lea.hbm %s196_s2, 128 }
  0x9f   :  { %p124_p7 = scmp.ne.s32.totalorder %s196_s2, %s123_s9  ;;  %p127_p8 = scmp.lt.u32.totalorder %s123_s9, %s196_s2 }
  0xa1   :  { %p129_p9 = pnand %p127_p8, %p124_p7 }
  0xa3   :  { %132 = shalt.err (!%p129_p9)
}
  0xa4   :  { %56 = dma.vmem_to_hbm [thread:$0]  %s54_s6, 128, %s196_s2, [#allocation4]  }
  0xa5   :  { %137 = dma.done.wait [#allocation4], 128  }
  0xa6   :  { %138 = vsyncadd [#allocation4], 4294967168 }
  0xa7   :  { %60 = vsyncpa [#allocation3], 1 }
  0xa8   :  { %61 = vsyncpa [#allocation6], 1 }
  0xa9   :  { %62 = vsyncpa [#allocation4], 1 }

</bundles_post_ra>
